<compile_context>
chip_gen: v5e
topology: v5e:2x2
jax: 0.10.0
libtpu: 0.0.40
codegen_flags: <defaults>
</compile_context>

<pallas_src>
import jax
import jax.numpy as jnp
from jax.experimental import pallas as pl
from jax.experimental.pallas import tpu as pltpu

_LANE = 128
_TARGET_BLOCK_BYTES = 4 * 1024 * 1024   # ~4 MiB blocks (sweet spot per sweeps)
_MIN_BLOCK_BYTES = 128 * 1024           # don't shrink below this to add steps
_MAX_COLS = 8192                        # cap for the unaligned-case column pick


def _round_up(v, m):
    return ((v + m - 1) // m) * m


def _cdiv(a, b):
    return -(-a // b)


def _largest_divisor(n, cap):
    """Largest divisor of n that is <= cap (trace-time Python, O(sqrt(n)))."""
    best = 1
    d = 1
    while d * d <= n:
        if n % d == 0:
            lo, hi = d, n // d
            if lo <= cap and lo > best:
                best = lo
            if hi <= cap and hi > best:
                best = hi
        d += 1
    return best


def _pick_tile_rows(rows, row_bytes):
    """Rows per block: ~4 MiB blocks, >=4 grid steps when possible, even grid."""
    t_target = max(8, (_TARGET_BLOCK_BYTES // row_bytes) // 8 * 8)
    t_floor = max(8, _round_up(_cdiv(_MIN_BLOCK_BYTES, row_bytes), 8))
    t_quarter = _round_up(_cdiv(rows, 4), 8)          # aim for >= 4 grid steps
    tile = min(t_target, max(t_quarter, t_floor))
    if tile >= rows:
        return rows                                   # truly small: one block
    # Prefer an even grid length so v7x's two TensorCores split evenly.
    grid = _cdiv(rows, tile)
    if grid % 2 == 1:
        alt = max(8, _round_up(_cdiv(rows, grid + 1), 8))
        if alt < rows and _cdiv(rows, alt) % 2 == 0:
            tile = alt
    return tile


def _scale_bias_kernel(w_ref, b_ref, x_ref, o_ref):
    # w_ref / b_ref: shape-(1,) f32 scalars in SMEM (whole-array, loaded once).
    # x_ref / o_ref: (tile_rows, cols) VMEM tiles.
    w = w_ref[0]
    b = b_ref[0]
    # f32 compute (matches PyTorch promotion; free filler on the VPU since the
    # kernel is HBM-bound), cast to the output dtype on store.
    o_ref[...] = (x_ref[...].astype(jnp.float32) * w + b).astype(o_ref.dtype)


def _run_2d(x2d, w_f32, b_f32, out_dtype, donate_input):
    rows, cols = x2d.shape
    row_bytes = cols * x2d.dtype.itemsize
    tile_rows = _pick_tile_rows(rows, row_bytes)
    grid = (pl.cdiv(rows, tile_rows),)
    return pl.pallas_call(
        _scale_bias_kernel,
        out_shape=jax.ShapeDtypeStruct((rows, cols), out_dtype),
        grid=grid,
        in_specs=[
            pl.BlockSpec(memory_space=pltpu.SMEM),                 # weight (1,)
            pl.BlockSpec(memory_space=pltpu.SMEM),                 # bias   (1,)
            pl.BlockSpec((tile_rows, cols), lambda i: (i, 0)),     # x tile
        ],
        out_specs=pl.BlockSpec((tile_rows, cols), lambda i: (i, 0)),
        input_output_aliases=({2: 0} if donate_input else {}),
        compiler_params=pltpu.CompilerParams(
            dimension_semantics=("parallel",),
            vmem_limit_bytes=32 * 1024 * 1024),
    )(w_f32, b_f32, x2d)


def compact_linear(x, weight, bias, *, donate_input=False):
    """y = x * weight + bias  (weight, bias are shape-(1,) params)."""
    orig_shape = x.shape
    # PyTorch type promotion: f32 params promote low-precision inputs to f32.
    out_dtype = jnp.result_type(x.dtype, weight.dtype, bias.dtype)

    w = weight.reshape(-1).astype(jnp.float32)
    b = bias.reshape(-1).astype(jnp.float32)

    flat = x.reshape(-1)
    n = flat.shape[0]

    if n < _LANE:
        # Truly tiny input: not worth a kernel launch.
        return ((flat.astype(jnp.float32) * w[0] + b[0])
                .astype(out_dtype).reshape(orig_shape))

    if n % _LANE == 0:
        cols = _LANE                       # lane-dense, unmasked stores
    else:
        cols = _largest_divisor(n, _MAX_COLS)
        if cols < 8:
            # Pathological (near-prime element count): a fused XLA elementwise
            # op has identical HBM traffic (1 read + 1 write); nothing to gain.
            return ((flat.astype(jnp.float32) * w[0] + b[0])
                    .astype(out_dtype).reshape(orig_shape))

    # Row-major contiguous reshape -> bitcast view, no extra HBM pass.
    x2d = flat.reshape(n // cols, cols)
    donate = donate_input and (out_dtype == x.dtype)
    out = _run_2d(x2d, w, b, out_dtype, donate)
    return out.reshape(orig_shape)


if __name__ == "__main__":
    key = jax.random.PRNGKey(0)
    kx, kw, kb, k2, k3, k4 = jax.random.split(key, 6)

    # Deterministic "parameters" mirroring torch.randn(1) init.
    weight = jax.random.normal(kw, (1,), dtype=jnp.float32)
    bias = jax.random.normal(kb, (1,), dtype=jnp.float32)

    # 1) Small NCHW input (lane-aligned element count -> single-block path).
    x = jax.random.normal(kx, (2, 4, 16, 16), dtype=jnp.float32)
    y = jax.block_until_ready(compact_linear(x, weight, bias))
    y_ref = x * weight + bias
    assert y.shape == x.shape and y.dtype == x.dtype
    assert jnp.allclose(y, y_ref, atol=1e-6, rtol=1e-6)

    # 2) Larger input exercising a multi-step (even) grid.
    x2 = jax.random.normal(k2, (2, 16, 128, 160), dtype=jnp.float32)
    y2 = jax.block_until_ready(compact_linear(x2, weight, bias))
    assert jnp.allclose(y2, x2 * weight + bias, atol=1e-6, rtol=1e-6)

    # 3) Non-lane-aligned element count (kernel path, no concatenate / padding).
    x3 = jax.random.normal(k3, (3, 5, 7, 11), dtype=jnp.float32)
    y3 = jax.block_until_ready(compact_linear(x3, weight, bias))
    assert jnp.allclose(y3, x3 * weight + bias, atol=1e-6, rtol=1e-6)

    # 4) bf16 input: output promotes to f32 like PyTorch (f32 parameters).
    x4 = jax.random.normal(k4, (4, 8, 32), dtype=jnp.bfloat16)
    y4 = jax.block_until_ready(compact_linear(x4, weight, bias))
    y4_ref = x4.astype(jnp.float32) * weight + bias
    assert y4.dtype == jnp.float32
    assert jnp.allclose(y4, y4_ref, atol=1e-6, rtol=1e-6)

    print("KERNEL_OK")
</pallas_src>

<mosaic_0001>
module attributes {stable_mosaic.version = 11 : i64} {
  func.func @_scale_bias_kernel(%arg0: i32, %arg1: memref<1xf32, #tpu.memory_space<smem>>, %arg2: memref<1xf32, #tpu.memory_space<smem>>, %arg3: memref<16x128xf32, #tpu.memory_space<vmem>>, %arg4: memref<16x128xf32, #tpu.memory_space<vmem>>) attributes {dimension_semantics = [#tpu.dimension_semantics<parallel>], iteration_bounds = array<i64: 1>, scalar_prefetch = 0 : i64, scratch_operands = 0 : i64, tpu.core_type = #tpu.core_type<tc>, window_params = [{transform_indices = @transform_0, window_bounds = array<i64: 1>}, {transform_indices = @transform_1, window_bounds = array<i64: 1>}, {transform_indices = @transform_2, window_bounds = array<i64: 16, 128>}, {transform_indices = @transform_3, window_bounds = array<i64: 16, 128>}]} {
    %c0 = arith.constant 0 : index
    %0 = memref.load %arg1[%c0] : memref<1xf32, #tpu.memory_space<smem>>
    %c0_0 = arith.constant 0 : index
    %1 = memref.load %arg2[%c0_0] : memref<1xf32, #tpu.memory_space<smem>>
    %c0_1 = arith.constant 0 : index
    %c0_2 = arith.constant 0 : index
    %2 = vector.load %arg3[%c0_1, %c0_2] : memref<16x128xf32, #tpu.memory_space<vmem>>, vector<16x128xf32>
    %3 = vector.broadcast %0 : f32 to vector<16x128xf32>
    %4 = arith.mulf %2, %3 : vector<16x128xf32>
    %5 = vector.broadcast %1 : f32 to vector<16x128xf32>
    %6 = arith.addf %4, %5 : vector<16x128xf32>
    %c0_3 = arith.constant 0 : index
    %c0_4 = arith.constant 0 : index
    %7 = vector.load %arg4[%c0_3, %c0_4] : memref<16x128xf32, #tpu.memory_space<vmem>>, vector<16x128xf32>
    tpu.vector_store %arg4[%c0_3, %c0_4], %6 {strides = array<i32>} : memref<16x128xf32, #tpu.memory_space<vmem>>, vector<16x128xf32>,
    return
  }
  func.func @transform_0(%arg0: i32) -> i32 {
    %c0_i32 = arith.constant 0 : i32
    %c0_i32_0 = arith.constant 0 : i32
    return %c0_i32 : i32
  }
  func.func @transform_1(%arg0: i32) -> i32 {
    %c0_i32 = arith.constant 0 : i32
    %c0_i32_0 = arith.constant 0 : i32
    return %c0_i32 : i32
  }
  func.func @transform_2(%arg0: i32) -> (i32, i32) {
    %c0_i32 = arith.constant 0 : i32
    %c0_i32_0 = arith.constant 0 : i32
    return %arg0, %c0_i32 : i32, i32
  }
  func.func @transform_3(%arg0: i32) -> (i32, i32) {
    %c0_i32 = arith.constant 0 : i32
    %c0_i32_0 = arith.constant 0 : i32
    return %arg0, %c0_i32 : i32, i32
  }
}

</mosaic_0001>

<bundles_post_ra>
// kernel: tpu_custom_call.1
= control target key start
LH: loop header
LB: loop body
LE: loop exit
PB: predicated region body
PF: predicated region fallthrough
CT: control target
= control target key end

     0   :  { %10 = vsyncpa [#allocation5], 0  ;;  %s156_s0 = inlined_call_operand.<no memory space> [shape: f32[1], index: 0, kind: input, shape index: {}]   ;;  %s157_s1 = inlined_call_operand.<no memory space> [shape: f32[1], index: 1, kind: input, shape index: {}]   ;;  %s158_s2 = inlined_call_operand.hbm [shape: f32[16,128], index: 2, kind: input, shape index: {}]   ;;  %s159_s3 = inlined_call_operand.hbm [shape: f32[16,128], index: 3, kind: output, shape index: {}]  }
   0x1   :  { %11 = vsyncpa [#allocation6], 0  ;;  %s20_s14 = sshll.u32 %s158_s2, 4  ;;  %s120_s15 = smov [#allocation4]   ;;  %s21_s14 = int_to_ptr.hbm [resolvable:$true] %s20_s14 }
   0x2   :  { %s22_s16 = sshll.u32 %s120_s15, 4  ;;  %s121_s17 = smov 128   ;;  %s23_s16 = int_to_ptr.vmem [resolvable:$true] %s22_s16 }
   0x3   :  { %s122_s18 = smov 8  }
   0x4   :  { %28 = dma.hbm_to_vmem [thread:$0]  %s21_s14, 256, %s23_s16, [#allocation5], %s121_s17, %s121_s17, %s122_s18  }
   0x5   :  { %116 = dma.done.wait [#allocation5], 256  }
   0x6   :  { %117 = vsyncadd [#allocation5], 4294967040  ;;  %v37_v0 = vstv %s156_s0  ;;  %v35_v1 = vld [vmem:[#allocation4] sm:$0xff]  ;;  %v40_v2 = vstv %s157_s1  ;;  %v36_v3 = vld [vmem:[#allocation4 + $0x8] sm:$0xff]  ;;  %s123_s2 = smov [#allocation7]   ;;  %s51_s26 = sshll.u32 %s159_s3, 4  ;;  %s52_s26 = int_to_ptr.hbm [resolvable:$true] %s51_s26 }
   0x7   :  { %v38_v4 = vmul.f32 %v37_v0, %v35_v1  ;;  %v39_v5 = vmul.f32 %v37_v0, %v36_v3  ;;  %s49_s23 = sshll.u32 %s123_s2, 4  ;;  %s50_s23 = int_to_ptr.vmem [resolvable:$true] %s49_s23 }
   0x9   :  { %v41_v6 = vadd.f32 %v40_v2, %v38_v4  ;;  %v42_v7 = vadd.f32 %v40_v2, %v39_v5 }
   0xb   :  { %43 = vst [vmem:[#allocation7] sm:$0xff] %v41_v6 }
   0xc   :  { %44 = vst [vmem:[#allocation7 + $0x8] sm:$0xff] %v42_v7 }
   0xd   :  { %57 = dma.vmem_to_hbm [thread:$0]  %s50_s23, 256, %s52_s26, [#allocation6], %s121_s17, %s121_s17, %s122_s18  }
   0xe   :  { %118 = dma.done.wait [#allocation6], 256  }
   0xf   :  { %119 = vsyncadd [#allocation6], 4294967040 }
  0x10   :  { %62 = vsyncpa [#allocation5], 1 }
  0x11   :  { %63 = vsyncpa [#allocation6], 1 }

</bundles_post_ra>
